<compile_context>
chip_gen: v7x
topology: tpu7x:2x2x1
jax: 0.10.0
libtpu: 0.0.40
codegen_flags: <defaults>
</compile_context>

<pallas_src>
import functools

import numpy as np
import jax
import jax.numpy as jnp
from jax.experimental import pallas as pl
from jax.experimental.pallas import tpu as pltpu

_LANES = 128
_SUBLANES = 8
_LANE_SHIFT = 7  # log2(_LANES)


def _round_up(a, b):
    return -(-a // b) * b


def _gather_kernel(flat_ref, w_ref, out_ref, *, n_chunks):
    """Lane dynamic gather of per-sample flat indices against the VMEM table.

    flat_ref: (rows_per_tile, 128) int32 — row-major flat index per sample.
    w_ref:    (n_chunks, 128) float32   — whole factor table, VMEM resident.
    out_ref:  (rows_per_tile, 128) float32.
    """
    rows, lanes = out_ref.shape
    flat = flat_ref[...]
    if n_chunks == 1:
        col = flat                      # table fits one 128-lane chunk
    else:
        col = flat & (lanes - 1)        # lane index within a 128-wide chunk
        chunk = flat >> _LANE_SHIFT     # which 128-wide chunk
    result = None
    for r in range(n_chunks):
        # Table row r replicated across the tile's sublanes as the gather
        # operand (one broadcast per chunk per tile, not per vreg).
        # TODO(synk): on JAX builds where pl.ds accepts stride=0, use the
        # sublane-broadcast read w_ref[pl.ds(r, rows, stride=0), :] so the
        # replication happens on load instead of via a VPU broadcast.
        table = jnp.broadcast_to(w_ref[r:r + 1, :], (rows, lanes))
        vals = jnp.take_along_axis(table, col, axis=-1, mode="promise_in_bounds")
        result = vals if result is None else jnp.where(chunk == r, vals, result)
    out_ref[...] = result


def gauss_factor_forward(x, weights, discrete_indices, *, max_rows_per_tile=1024):
    """GaussFactor.forward: per-sample lookup into the dense factor table.

    x:                (N, R) integer samples over all random variables.
    weights:          dense table, shape = [domain_length of each discrete rv].
    discrete_indices: column indices of the discrete rvs inside x.
    Returns (N,) float32 potentials: weights[x[:, d0], x[:, d1], ...].
    Inputs are assumed in-domain (as in the PyTorch reference); out-of-domain
    values are not detected.
    """
    discrete_indices = tuple(int(i) for i in discrete_indices)
    domain_lengths = tuple(int(d) for d in weights.shape)
    D = len(domain_lengths)
    assert D >= 1 and len(discrete_indices) == D
    N = int(x.shape[0])

    # Row-major strides of the factor table (static Python ints).
    strides = []
    acc = 1
    for dl in reversed(domain_lengths):
        strides.append(acc)
        acc *= dl
    strides = tuple(reversed(strides))
    W = acc
    n_chunks = -(-W // _LANES)

    # Flat row-major index per sample, computed in XLA (a few fused int
    # mul/adds over (N,) slices).  Kernel input traffic: 4 B/sample.
    x_i = x.astype(jnp.int32)
    flat = x_i[:, discrete_indices[0]] * strides[0]
    for c, s in zip(discrete_indices[1:], strides[1:]):
        flat = flat + x_i[:, c] * s

    # Samples on lanes: (rows, 128).  Balance rows across grid steps so the
    # last step is not mostly padding; each step handles up to
    # max_rows_per_tile * 128 samples.
    rows_needed = max(1, -(-N // _LANES))
    num_tiles = -(-rows_needed // max_rows_per_tile)
    rows_per_tile = _round_up(-(-rows_needed // num_tiles), _SUBLANES)
    rows_total = num_tiles * rows_per_tile
    n_total = rows_total * _LANES
    if n_total != N:
        flat = jnp.pad(flat, (0, n_total - N))   # padded samples hit entry 0 (valid)
    flat2d = flat.reshape(rows_total, _LANES)

    # Flat weight table padded to whole 128-lane chunks (tiny, constant).
    w_flat = weights.reshape(-1).astype(jnp.float32)
    w_pad = jnp.pad(w_flat, (0, n_chunks * _LANES - W)).reshape(n_chunks, _LANES)

    kernel = functools.partial(_gather_kernel, n_chunks=n_chunks)

    out = pl.pallas_call(
        kernel,
        out_shape=jax.ShapeDtypeStruct((rows_total, _LANES), jnp.float32),
        grid=(num_tiles,),
        in_specs=[
            pl.BlockSpec((rows_per_tile, _LANES), lambda i: (i, 0)),
            # Whole constant table resident in VMEM once (no per-step DMA).
            pl.BlockSpec(memory_space=pltpu.MemorySpace.VMEM),
        ],
        out_specs=pl.BlockSpec((rows_per_tile, _LANES), lambda i: (i, 0)),
        compiler_params=pltpu.CompilerParams(
            # Independent sample tiles -> shard grid steps across TCs (v7x).
            dimension_semantics=("parallel",),
            # Explicit headroom; fits every generation (v7x: 64 MiB physical).
            vmem_limit_bytes=32 * 1024 * 1024,
        ),
    )(flat2d, w_pad)

    return out.reshape(-1)[:N]


if __name__ == "__main__":
    key = jax.random.PRNGKey(0)

    # --- Case 1: small table (4*5 = 20 entries -> one 128-lane chunk) --------
    # random variables: [discrete(4), continuous, discrete(5)]
    domain_lengths = (4, 5)
    discrete_indices = (0, 2)
    N = 2500
    k1, k2, k3, kw, key = jax.random.split(key, 5)
    x = jnp.stack([
        jax.random.randint(k1, (N,), 0, domain_lengths[0], dtype=jnp.int32),
        jax.random.randint(k2, (N,), 0, 10, dtype=jnp.int32),   # continuous rv col (unused)
        jax.random.randint(k3, (N,), 0, domain_lengths[1], dtype=jnp.int32),
    ], axis=1)
    # __init__ uses torch.full(fill_value=1.0); varied values exercise the gather.
    weights = jax.random.uniform(kw, domain_lengths, dtype=jnp.float32)

    out = jax.block_until_ready(gauss_factor_forward(x, weights, discrete_indices))
    ref = weights[x[:, 0], x[:, 2]]
    np.testing.assert_allclose(np.asarray(out), np.asarray(ref), rtol=1e-6, atol=1e-6)

    # --- Case 2: wider table (16*20 = 320 entries -> 3 lane chunks) ----------
    # random variables: [continuous, discrete(16), discrete(20)]
    domain_lengths2 = (16, 20)
    discrete_indices2 = (1, 2)
    N2 = 1500
    k1, k2, k3, kw2, key = jax.random.split(key, 5)
    x2 = jnp.stack([
        jax.random.randint(k1, (N2,), 0, 7, dtype=jnp.int32),   # continuous rv col (unused)
        jax.random.randint(k2, (N2,), 0, domain_lengths2[0], dtype=jnp.int32),
        jax.random.randint(k3, (N2,), 0, domain_lengths2[1], dtype=jnp.int32),
    ], axis=1)
    weights2 = jax.random.uniform(kw2, domain_lengths2, dtype=jnp.float32)

    out2 = jax.block_until_ready(gauss_factor_forward(x2, weights2, discrete_indices2))
    ref2 = weights2[x2[:, 1], x2[:, 2]]
    np.testing.assert_allclose(np.asarray(out2), np.asarray(ref2), rtol=1e-6, atol=1e-6)

    print("KERNEL_OK")
</pallas_src>

<mosaic_0001>
module attributes {stable_mosaic.version = 11 : i64} {
  func.func @_gather_kernel(%arg0: i32, %arg1: memref<24x128xi32, #tpu.memory_space<vmem>>, %arg2: memref<1x128xf32, #tpu.memory_space<vmem>>, %arg3: memref<24x128xf32, #tpu.memory_space<vmem>>) attributes {dimension_semantics = [#tpu.dimension_semantics<parallel>], iteration_bounds = array<i64: 1>, scalar_prefetch = 0 : i64, scratch_operands = 0 : i64, tpu.core_type = #tpu.core_type<tc>, window_params = [{transform_indices = @transform_0, window_bounds = array<i64: 24, 128>}, {pipeline_mode = #tpu.pipeline_mode<synchronous>, transform_indices = @transform_1, window_bounds = array<i64: 1, 128>}, {transform_indices = @transform_2, window_bounds = array<i64: 24, 128>}]} {
    %c0 = arith.constant 0 : index
    %c0_0 = arith.constant 0 : index
    %0 = vector.load %arg1[%c0, %c0_0] : memref<24x128xi32, #tpu.memory_space<vmem>>, vector<24x128xi32>
    %c0_1 = arith.constant 0 : index
    %c0_2 = arith.constant 0 : index
    %1 = vector.load %arg2[%c0_1, %c0_2] : memref<1x128xf32, #tpu.memory_space<vmem>>, vector<1x128xf32>
    %2 = vector.shape_cast %1 : vector<1x128xf32> to vector<1x128xf32>
    %3 = vector.broadcast %2 : vector<1x128xf32> to vector<24x128xf32>
    %4 = vector.shape_cast %0 : vector<24x128xi32> to vector<24x128x1xi32>
    %5 = vector.shape_cast %4 : vector<24x128x1xi32> to vector<24x128xi32>
    %6 = tpu.dynamic_gather %3[%5] in [1] : vector<24x128xf32>, vector<24x128xi32> -> vector<24x128xf32>
    %c0_3 = arith.constant 0 : index
    %c0_4 = arith.constant 0 : index
    %7 = vector.load %arg3[%c0_3, %c0_4] : memref<24x128xf32, #tpu.memory_space<vmem>>, vector<24x128xf32>
    tpu.vector_store %arg3[%c0_3, %c0_4], %6 {strides = array<i32>} : memref<24x128xf32, #tpu.memory_space<vmem>>, vector<24x128xf32>,
    return
  }
  func.func @transform_0(%arg0: i32) -> (i32, i32) {
    %c0_i32 = arith.constant 0 : i32
    %c0_i32_0 = arith.constant 0 : i32
    return %arg0, %c0_i32 : i32, i32
  }
  func.func @transform_1(%arg0: i32) -> (i32, i32) {
    %c0_i32 = arith.constant 0 : i32
    %c0_i32_0 = arith.constant 0 : i32
    %c0_i32_1 = arith.constant 0 : i32
    return %c0_i32, %c0_i32_0 : i32, i32
  }
  func.func @transform_2(%arg0: i32) -> (i32, i32) {
    %c0_i32 = arith.constant 0 : i32
    %c0_i32_0 = arith.constant 0 : i32
    return %arg0, %c0_i32 : i32, i32
  }
}

</mosaic_0001>

<bundles_post_ra>
// kernel: tpu_custom_call.1
= control target key start
LH: loop header
LB: loop body
LE: loop exit
PB: predicated region body
PF: predicated region fallthrough
CT: control target
= control target key end

     0   :  { %7 = vsyncpa [#allocation3], 0  ;;  %s174_s0 = inlined_call_operand.hbm [shape: s32[24,128], index: 0, kind: input, shape index: {}]   ;;  %s175_s1 = inlined_call_operand.vmem [shape: f32[1,128], index: 1, kind: input, shape index: {}]   ;;  %s176_s2 = inlined_call_operand.hbm [shape: f32[24,128], index: 2, kind: output, shape index: {}]  }
   0x1   :  { %8 = vsyncpa [#allocation4], 0  ;;  %s122_s9 = smov [#allocation2]   ;;  %s74_s13 = scalar_lea.hbm %s174_s0, 384 }
   0x2   :  { %s14_s10 = sshll.u32 %s122_s9, 4  ;;  %p75_p0 = scmp.ne.s32.totalorder %s174_s0, %s74_s13  ;;  %s15_s10 = int_to_ptr.vmem [resolvable:$true] %s14_s10 }
   0x3   :  { %p78_p1 = scmp.lt.u32.totalorder %s74_s13, %s174_s0 }
   0x5   :  { %p80_p2 = pnand %p78_p1, %p75_p0 }
   0x7   :  { %83 = shalt.err (!%p80_p2)
}
   0x8   :  { %s84_s18 = scalar_lea.vmem %s15_s10, 384  ;;  %p89_p4 = scmp.lt.s32.totalorder %s15_s10, %s15_s10 }
   0x9   :  { %p85_p3 = scmp.ne.s32.totalorder %s15_s10, %s84_s18  ;;  %p90_p5 = scmp.lt.s32.totalorder %s84_s18, %s84_s18 }
   0xb   :  { %p91_p6 = por %p90_p5, %p89_p4 }
   0xd   :  { %p92_p7 = pnand %p91_p6, %p85_p3 }
   0xf   :  { %95 = shalt.err (!%p92_p7)
}
  0x10   :  { %s123_s19 = smov 128   ;;  %s124_s20 = smov 8  }
  0x11   :  { %20 = dma.hbm_to_vmem [thread:$0]  %s174_s0, 384, %s15_s10, [#allocation3], %s123_s19, %s123_s19, %s124_s20  }
  0x12   :  { %118 = dma.done.wait [#allocation3], 384  }
  0x13   :  { %119 = vsyncadd [#allocation3], 4294966912  ;;  %v26_v0 = vld [vmem:[#allocation2] sm:$0xff]  ;;  %v28_v1 = vld [vmem:[#allocation2 + $0x10] sm:$0xff]  ;;  %s125_s0 = smov [#allocation5]  }
  0x14   :  { %70 = vset.pattern.permute.xlu0 %v26_v0  ;;  %72 = vset.pattern.permute.xlu1 %v28_v1  ;;  %v65_v2 = vld [vmem:[%s175_s1] ss:$0 sm:$0xff]  ;;  %v27_v3 = vld [vmem:[#allocation2 + $0x8] sm:$0xff]  ;;  %s53_s25 = sshll.u32 %s125_s0, 4  ;;  %s54_s25 = int_to_ptr.vmem [resolvable:$true] %s53_s25 }
  0x15   :  { %s96_s26 = scalar_lea.vmem %s54_s25, 384  ;;  %p101_p9 = scmp.lt.s32.totalorder %s54_s25, %s54_s25 }
  0x16   :  { %p97_p8 = scmp.ne.s32.totalorder %s54_s25, %s96_s26  ;;  %p102_p10 = scmp.lt.s32.totalorder %s96_s26, %s96_s26 }
  0x18   :  { %37 = vperm.xlu0 %70, %v65_v2   ;;  %43 = vperm.xlu1 %72, %v65_v2   ;;  %p103_p11 = por %p102_p10, %p101_p9 }
  0x1a   :  { %p104_p12 = pnand %p103_p11, %p97_p8 }
  0x1c   :  { %71 = vset.pattern.permute.xlu0 %v27_v3 }
  0x20   :  { %40 = vperm.xlu0 %71, %v65_v2  }
  0x24   :  { %73 = vset.pattern.permute.xlu0 %v28_v1 }
  0x97   :  { %v38_v4 = vpop.permute.xlu0 %37  ;;  %v44_v5 = vpop.permute.xlu1 %43 }
  0x98   :  { %45 = vst [vmem:[#allocation5] sm:$0xff] %v38_v4  ;;  %47 = vst [vmem:[#allocation5 + $0x10] sm:$0xff] %v44_v5 }
  0x9f   :  { %v41_v6 = vpop.permute.xlu0 %40 }
  0xa0   :  { %46 = vst [vmem:[#allocation5 + $0x8] sm:$0xff] %v41_v6 }
  0xa1   :  { %107 = shalt.err (!%p104_p12)
}
  0xa2   :  { %s108_s28 = scalar_lea.hbm %s176_s2, 384 }
  0xa3   :  { %p109_p13 = scmp.ne.s32.totalorder %s176_s2, %s108_s28  ;;  %p112_p0 = scmp.lt.u32.totalorder %s108_s28, %s176_s2 }
  0xa5   :  { %p114_p1 = pnand %p112_p0, %p109_p13 }
  0xa7   :  { %117 = shalt.err (!%p114_p1)
}
  0xa8   :  { %59 = dma.vmem_to_hbm [thread:$0]  %s54_s25, 384, %s176_s2, [#allocation4], %s123_s19, %s123_s19, %s124_s20  }
  0xa9   :  { %120 = dma.done.wait [#allocation4], 384  }
  0xaa   :  { %121 = vsyncadd [#allocation4], 4294966912 }
  0xab   :  { %63 = vsyncpa [#allocation3], 1 }
  0xac   :  { %64 = vsyncpa [#allocation4], 1 }

</bundles_post_ra>
